<compile_context>
chip_gen: v7x
topology: tpu7x:2x2x1
jax: 0.10.0
libtpu: 0.0.40
codegen_flags: <defaults>
</compile_context>

<pallas_src>
import math

import jax
import jax.numpy as jnp
from jax.experimental import pallas as pl
from jax.experimental.pallas import tpu as pltpu


_LANE = 128
_MAX_LANE_WIDTH = 8 * _LANE            # up to 1024 lanes per block (lane-dense output)
_TARGET_TILE_BYTES = 2 * 1024 * 1024   # ~2 MiB per pipelined buffer


def _copy_kernel(x_ref, o_ref):
    # Identity copy of the current (TR, C) tile.
    o_ref[...] = x_ref[...]


def _choose_lane_width(total):
    """Largest C = k*128 (C <= _MAX_LANE_WIDTH) that divides `total`, or None."""
    if total % _LANE != 0:
        return None
    c = min(_MAX_LANE_WIDTH, (total // _LANE) * _LANE)
    while c >= _LANE:
        if total % c == 0:
            return c
        c -= _LANE
    return None


def _pallas_identity_copy_2d(x2d):
    """Tiled, pipelined identity copy of a contiguous 2-D slab."""
    rows, cols = x2d.shape
    itemsize = x2d.dtype.itemsize
    # Sublane packing: 8 rows for 4-byte, 16 for 2-byte, 32 for 1-byte dtypes.
    smult = max(1, 32 // itemsize)

    # Row tile: ~_TARGET_TILE_BYTES per buffer, rounded down to a sublane multiple.
    tr = (_TARGET_TILE_BYTES // max(1, cols * itemsize)) // smult * smult
    tr = max(smult, tr)
    tr = min(rows, tr)
    # If the whole array is smaller than one sublane group, use the full extent.
    if rows < smult:
        tr = rows

    grid = (pl.cdiv(rows, tr),)
    return pl.pallas_call(
        _copy_kernel,
        out_shape=jax.ShapeDtypeStruct((rows, cols), x2d.dtype),
        grid=grid,
        in_specs=[pl.BlockSpec((tr, cols), lambda i: (i, 0))],
        out_specs=pl.BlockSpec((tr, cols), lambda i: (i, 0)),
        compiler_params=pltpu.CompilerParams(
            dimension_semantics=("parallel",),
        ),
    )(x2d)


def _resolve_view_shape(target_shape, total):
    """Resolve a torch.view-style shape (allowing a single -1 entry)."""
    target_shape = [int(s) for s in target_shape]
    if target_shape.count(-1) > 1:
        raise ValueError("only one dimension can be inferred (-1)")
    for s in target_shape:
        if s != -1 and s <= 0:
            raise ValueError(f"invalid dimension {s} in view shape")
    if -1 in target_shape:
        known = 1
        for s in target_shape:
            if s != -1:
                known *= s
        if known == 0 or total % known != 0:
            raise ValueError("shape incompatible with number of elements")
        target_shape[target_shape.index(-1)] = total // known
    else:
        prod = math.prod(target_shape) if target_shape else 1
        if prod != total:
            raise ValueError("shape incompatible with number of elements")
    return tuple(target_shape)


class View:
    """JAX/Pallas equivalent of the PyTorch View module (materializing copy + reshape)."""

    def __init__(self, shape):
        # Mirrors register_buffer('shape', LongTensor(shape)); no learnable params.
        self.shape = tuple(int(s) for s in shape)

    def __call__(self, x):
        total = int(x.size)
        out_shape = _resolve_view_shape(self.shape, total)

        # Flatten the contiguous (row-major) buffer into a lane-dense 2-D slab
        # (rows, C) with C a large multiple of 128 when possible; this preserves
        # element order exactly, so the final reshape reproduces torch.view.
        cols = _choose_lane_width(total)
        if cols is None:
            # Total not a multiple of 128 (tiny/odd inputs): single full-extent block.
            x2d = x.reshape(1, total)
        else:
            x2d = x.reshape(total // cols, cols)

        copied = _pallas_identity_copy_2d(x2d)
        return copied.reshape(out_shape)


if __name__ == "__main__":
    key = jax.random.PRNGKey(0)
    # NCHW input as it would arrive from a conv stack in disentanglement_lib.
    x = jax.random.normal(key, (2, 4, 16, 16), dtype=jnp.float32)

    # Typical usage: flatten conv features before a fully-connected layer.
    view = View((-1, 4 * 16 * 16))
    out = view(x)
    out = jax.block_until_ready(out)

    # Correctness check against plain JAX reshape (== torch .view on contiguous).
    ref = x.reshape(-1, 4 * 16 * 16)
    assert out.shape == (2, 1024), out.shape
    assert out.dtype == x.dtype
    assert bool(jnp.array_equal(out, ref))

    # Also exercise a shape that is not a multiple of 128 elements (fallback path)
    # and a bf16 input (sublane-packing path).
    y = jax.random.normal(jax.random.PRNGKey(1), (3, 5, 7), dtype=jnp.float32)
    out_y = jax.block_until_ready(View((-1,))(y))
    assert bool(jnp.array_equal(out_y, y.reshape(-1)))

    z = jax.random.normal(jax.random.PRNGKey(2), (4, 8, 8, 8), dtype=jnp.bfloat16)
    out_z = jax.block_until_ready(View((4, -1))(z))
    assert bool(jnp.array_equal(out_z, z.reshape(4, -1)))

    print("KERNEL_OK")
</pallas_src>

<mosaic_0001>
module attributes {stable_mosaic.version = 11 : i64} {
  func.func @_copy_kernel(%arg0: i32, %arg1: memref<2x1024xf32, #tpu.memory_space<vmem>>, %arg2: memref<2x1024xf32, #tpu.memory_space<vmem>>) attributes {dimension_semantics = [#tpu.dimension_semantics<parallel>], iteration_bounds = array<i64: 1>, scalar_prefetch = 0 : i64, scratch_operands = 0 : i64, tpu.core_type = #tpu.core_type<tc>, window_params = [{transform_indices = @transform_0, window_bounds = array<i64: 2, 1024>}, {transform_indices = @transform_1, window_bounds = array<i64: 2, 1024>}]} {
    %c0 = arith.constant 0 : index
    %c0_0 = arith.constant 0 : index
    %0 = vector.load %arg1[%c0, %c0_0] : memref<2x1024xf32, #tpu.memory_space<vmem>>, vector<2x1024xf32>
    %c0_1 = arith.constant 0 : index
    %c0_2 = arith.constant 0 : index
    %1 = vector.load %arg2[%c0_1, %c0_2] : memref<2x1024xf32, #tpu.memory_space<vmem>>, vector<2x1024xf32>
    tpu.vector_store %arg2[%c0_1, %c0_2], %0 {strides = array<i32>} : memref<2x1024xf32, #tpu.memory_space<vmem>>, vector<2x1024xf32>,
    return
  }
  func.func @transform_0(%arg0: i32) -> (i32, i32) {
    %c0_i32 = arith.constant 0 : i32
    %c0_i32_0 = arith.constant 0 : i32
    return %arg0, %c0_i32 : i32, i32
  }
  func.func @transform_1(%arg0: i32) -> (i32, i32) {
    %c0_i32 = arith.constant 0 : i32
    %c0_i32_0 = arith.constant 0 : i32
    return %arg0, %c0_i32 : i32, i32
  }
}

</mosaic_0001>

<bundles_post_ra>
// kernel: tpu_custom_call.1
= control target key start
LH: loop header
LB: loop body
LE: loop exit
PB: predicated region body
PF: predicated region fallthrough
CT: control target
= control target key end

     0   :  { %6 = vsyncpa [#allocation3], 0  ;;  %s126_s0 = inlined_call_operand.hbm [shape: f32[2,1024], index: 0, kind: input, shape index: {}]   ;;  %s127_s1 = inlined_call_operand.hbm [shape: f32[2,1024], index: 1, kind: output, shape index: {}]  }
   0x1   :  { %7 = vsyncpa [#allocation4], 0  ;;  %s90_s6 = smov [#allocation2]   ;;  %s42_s10 = scalar_lea.hbm %s126_s0, 256 }
   0x2   :  { %s14_s7 = sshll.u32 %s90_s6, 4  ;;  %p43_p0 = scmp.ne.s32.totalorder %s126_s0, %s42_s10  ;;  %s15_s7 = int_to_ptr.vmem [resolvable:$true] %s14_s7 }
   0x3   :  { %p46_p1 = scmp.lt.u32.totalorder %s42_s10, %s126_s0 }
   0x5   :  { %p48_p2 = pnand %p46_p1, %p43_p0 }
   0x7   :  { %51 = shalt.err (!%p48_p2)
}
   0x8   :  { %s52_s15 = scalar_lea.vmem %s15_s7, 256  ;;  %p57_p4 = scmp.lt.s32.totalorder %s15_s7, %s15_s7 }
   0x9   :  { %p53_p3 = scmp.ne.s32.totalorder %s15_s7, %s52_s15  ;;  %p58_p5 = scmp.lt.s32.totalorder %s52_s15, %s52_s15 }
   0xb   :  { %p59_p6 = por %p58_p5, %p57_p4 }
   0xd   :  { %p60_p7 = pnand %p59_p6, %p53_p3 }
   0xf   :  { %63 = shalt.err (!%p60_p7)
}
  0x10   :  { %17 = dma.hbm_to_vmem [thread:$0]  %s126_s0, 256, %s15_s7, [#allocation3]  }
  0x11   :  { %86 = dma.done.wait [#allocation3], 256  }
  0x12   :  { %87 = vsyncadd [#allocation3], 4294967040  ;;  %s91_s18 = smov [#allocation5]   ;;  %v21_v0 = vld [vmem:[#allocation2] sm:$0xff]  ;;  %v22_v1 = vld [vmem:[#allocation2 + $0x8] sm:$0xff] }
  0x13   :  { %s31_s19 = sshll.u32 %s91_s18, 4  ;;  %23 = vst [vmem:[#allocation5] sm:$0xff] %v21_v0  ;;  %24 = vst [vmem:[#allocation5 + $0x8] sm:$0xff] %v22_v1  ;;  %s32_s19 = int_to_ptr.vmem [resolvable:$true] %s31_s19 }
  0x14   :  { %s64_s20 = scalar_lea.vmem %s32_s19, 256  ;;  %p69_p9 = scmp.lt.s32.totalorder %s32_s19, %s32_s19 }
  0x15   :  { %p65_p8 = scmp.ne.s32.totalorder %s32_s19, %s64_s20  ;;  %p70_p10 = scmp.lt.s32.totalorder %s64_s20, %s64_s20 }
  0x17   :  { %p71_p11 = por %p70_p10, %p69_p9 }
  0x19   :  { %p72_p12 = pnand %p71_p11, %p65_p8 }
  0x1b   :  { %75 = shalt.err (!%p72_p12)
}
  0x1c   :  { %s76_s0 = scalar_lea.hbm %s127_s1, 256 }
  0x1d   :  { %p77_p13 = scmp.ne.s32.totalorder %s127_s1, %s76_s0  ;;  %p80_p0 = scmp.lt.u32.totalorder %s76_s0, %s127_s1 }
  0x1f   :  { %p82_p1 = pnand %p80_p0, %p77_p13 }
  0x21   :  { %85 = shalt.err (!%p82_p1)
}
  0x22   :  { %34 = dma.vmem_to_hbm [thread:$0]  %s32_s19, 256, %s127_s1, [#allocation4]  }
  0x23   :  { %88 = dma.done.wait [#allocation4], 256  }
  0x24   :  { %89 = vsyncadd [#allocation4], 4294967040 }
  0x25   :  { %38 = vsyncpa [#allocation3], 1 }
  0x26   :  { %39 = vsyncpa [#allocation4], 1 }

</bundles_post_ra>
